<compile_context>
chip_gen: v5e
topology: v5e:2x2
jax: 0.10.0
libtpu: 0.0.40
codegen_flags: <defaults>
</compile_context>

<pallas_src>
import jax
import jax.numpy as jnp
from jax.experimental import pallas as pl
from jax.experimental.pallas import tpu as pltpu

# ---------------- model hyper-parameters (small, deterministic) ----------------
CHANNEL_IN = 4
CHANNEL_OUT = 6
LINEAR_SIZE = 32
BLOCK_NUM = 2
BATCH = 2
LENGTH = 8
BN_EPS = 1e-5
NEG_SLOPE = 0.2
NUM_LAYERS = 2 + 2 * BLOCK_NUM          # fc_1, (w1, w2) per block, fc_2
NUM_MID = 2 * BLOCK_NUM
OUT_PAD = 8                             # output rows padded to one sublane tile
LANE_TILE_MAX = 512                     # ~85% of HBM roofline at 512-lane tiles


def _leaky_relu(x):
    # 2 VALU ops (mul+max); identical to where(x>=0, x, 0.2x) for slope in (0,1).
    return jnp.maximum(x, NEG_SLOPE * x)


# ------------------------------- kernel ---------------------------------------
def fcblock_kernel(x_ref, wfc1_ref, w_ref, b_ref, out_ref):
    """x_ref: (C_in, TN); wfc1_ref: (H, C_in); w_ref: (2*BLOCK_NUM+1, H, H);
    b_ref: (NUM_LAYERS, H, 1); out_ref: (OUT_PAD, TN).

    Channels live on sublanes, flattened batch*length positions on lanes, so
    every Conv1d(k=1) is a plain (H, C) @ (C, TN) MXU matmul with no transposes
    and no per-batch loop.
    """
    x = x_ref[...]                                           # (C_in, TN)

    # fc_1 (BN folded)
    h = jnp.dot(wfc1_ref[...], x, preferred_element_type=jnp.float32) + b_ref[0]
    h = _leaky_relu(h)

    # residual Linear blocks (BN folded); BLOCK_NUM is tiny -> static unroll
    for i in range(BLOCK_NUM):
        y = jnp.dot(w_ref[2 * i], h, preferred_element_type=jnp.float32) + b_ref[1 + 2 * i]
        y = _leaky_relu(y)
        y = jnp.dot(w_ref[2 * i + 1], y, preferred_element_type=jnp.float32) + b_ref[2 + 2 * i]
        y = _leaky_relu(y)
        h = h + y

    # fc_2: zero-padded to 8 output rows; slice is sublane-tile aligned.
    w2 = w_ref[NUM_MID, :OUT_PAD, :]                         # (8, H)
    b2 = b_ref[NUM_LAYERS - 1, :OUT_PAD, :]                  # (8, 1)
    out = jnp.dot(w2, h, preferred_element_type=jnp.float32) + b2
    out_ref[...] = out.astype(out_ref.dtype)


# ------------------------------- wrapper ---------------------------------------
def fcblock_pallas(x_ncl, wfc1, w_packed, b_packed):
    """x_ncl: (B, C_in, L) f32 -> (B, C_out, L) f32."""
    B, c_in, L = x_ncl.shape
    N = B * L

    # Flatten batch into the lane (position) axis and pad lanes to a multiple of
    # the tile so stores are lane-dense / unmasked.
    x_flat = jnp.transpose(x_ncl, (1, 0, 2)).reshape(c_in, N)
    n_pad = pl.cdiv(N, 128) * 128
    if n_pad > LANE_TILE_MAX:
        tile_n = LANE_TILE_MAX
        n_pad = pl.cdiv(n_pad, tile_n) * tile_n
    else:
        tile_n = n_pad
    if n_pad != N:
        x_flat = jnp.pad(x_flat, ((0, 0), (0, n_pad - N)))
    grid = (n_pad // tile_n,)

    H = LINEAR_SIZE
    flops = 2 * n_pad * (H * c_in + BLOCK_NUM * 2 * H * H + OUT_PAD * H)
    bytes_accessed = 4 * (x_flat.size + wfc1.size + w_packed.size
                          + b_packed.size + OUT_PAD * n_pad)

    out_pad = pl.pallas_call(
        fcblock_kernel,
        out_shape=jax.ShapeDtypeStruct((OUT_PAD, n_pad), jnp.float32),
        grid_spec=pltpu.PrefetchScalarGridSpec(
            num_scalar_prefetch=0,
            grid=grid,
            in_specs=[
                # Only x streams per grid step; weights/biases are fetched once
                # (constant index_map) and stay VMEM-resident.
                pl.BlockSpec((c_in, tile_n), lambda n: (0, n)),
                pl.BlockSpec((H, c_in), lambda n: (0, 0)),
                pl.BlockSpec((NUM_MID + 1, H, H), lambda n: (0, 0, 0)),
                pl.BlockSpec((NUM_LAYERS, H, 1), lambda n: (0, 0, 0)),
            ],
            out_specs=pl.BlockSpec((OUT_PAD, tile_n), lambda n: (0, n)),
        ),
        compiler_params=pltpu.CompilerParams(
            dimension_semantics=("parallel",)),   # shards the position grid across TCs on v7x
        cost_estimate=pl.CostEstimate(flops=flops, transcendentals=0,
                                      bytes_accessed=bytes_accessed),
    )(x_flat, wfc1, w_packed, b_packed)

    out = out_pad[:CHANNEL_OUT, :N]                           # drop zero-pad rows/cols
    return out.reshape(CHANNEL_OUT, B, L).transpose(1, 0, 2)  # back to NCL


# ------------------- deterministic parameters (PyTorch-style) ------------------
def make_raw_params(key):
    keys = jax.random.split(key, 64)
    kit = iter(keys)

    def normal(shape, scale=0.1):
        return scale * jax.random.normal(next(kit), shape, dtype=jnp.float32)

    def bn_params(C):
        gamma = 1.0 + normal((C,), 0.05)
        beta = normal((C,), 0.05)
        mean = normal((C,), 0.05)
        var = 1.0 + jnp.abs(normal((C,), 0.05))
        return gamma, beta, mean, var

    raw = {
        "wfc1": normal((LINEAR_SIZE, CHANNEL_IN)),    # Conv1d weight stored (out, in)
        "bfc1": normal((LINEAR_SIZE,)),
        "bn1": bn_params(LINEAR_SIZE),
        "w1": [normal((LINEAR_SIZE, LINEAR_SIZE)) for _ in range(BLOCK_NUM)],
        "b1": [normal((LINEAR_SIZE,)) for _ in range(BLOCK_NUM)],
        "bnA": [bn_params(LINEAR_SIZE) for _ in range(BLOCK_NUM)],
        "w2": [normal((LINEAR_SIZE, LINEAR_SIZE)) for _ in range(BLOCK_NUM)],
        "b2": [normal((LINEAR_SIZE,)) for _ in range(BLOCK_NUM)],
        "bnB": [bn_params(LINEAR_SIZE) for _ in range(BLOCK_NUM)],
        "wfc2": normal((CHANNEL_OUT, LINEAR_SIZE)),
        "bfc2": normal((CHANNEL_OUT,)),
    }
    return raw


def pack_params(raw):
    """Fold eval-mode BN + conv biases into the weights; pack into 3 operands:
    wfc1 (H, C_in), w_packed (2*BLOCK_NUM+1, H, H) with fc_2 zero-padded in the
    last slot, b_packed (NUM_LAYERS, H, 1)."""
    def fold(W, b, gamma, beta, mean, var):
        s = gamma / jnp.sqrt(var + BN_EPS)
        return W * s[:, None], b * s + (beta - mean * s)

    H = LINEAR_SIZE
    wfc1, bfc1 = fold(raw["wfc1"], raw["bfc1"], *raw["bn1"])      # (H, C_in), (H,)

    Wp = jnp.zeros((NUM_MID + 1, H, H), jnp.float32)
    Bp = jnp.zeros((NUM_LAYERS, H), jnp.float32)
    Bp = Bp.at[0].set(bfc1)
    for i in range(BLOCK_NUM):
        wa, ba = fold(raw["w1"][i], raw["b1"][i], *raw["bnA"][i])
        wb, bb = fold(raw["w2"][i], raw["b2"][i], *raw["bnB"][i])
        Wp = Wp.at[2 * i].set(wa)
        Bp = Bp.at[1 + 2 * i].set(ba)
        Wp = Wp.at[2 * i + 1].set(wb)
        Bp = Bp.at[2 + 2 * i].set(bb)
    Wp = Wp.at[NUM_MID, :CHANNEL_OUT, :].set(raw["wfc2"])
    Bp = Bp.at[NUM_LAYERS - 1, :CHANNEL_OUT].set(raw["bfc2"])

    # Correctness of the padded-output formulation requires the pad rows stay 0.
    assert float(jnp.max(jnp.abs(Wp[NUM_MID, CHANNEL_OUT:, :]))) == 0.0
    assert float(jnp.max(jnp.abs(Bp[NUM_LAYERS - 1, CHANNEL_OUT:]))) == 0.0

    return wfc1, Wp, Bp.reshape(NUM_LAYERS, H, 1)


# --------------------- pure-JAX reference (unfolded, NCL) ----------------------
def fcblock_ref(x_ncl, raw):
    def conv1x1(x, W, b):
        return jnp.einsum("oc,bcl->bol", W, x) + b[None, :, None]

    def bn_eval(x, gamma, beta, mean, var):
        s = gamma / jnp.sqrt(var + BN_EPS)
        return x * s[None, :, None] + (beta - mean * s)[None, :, None]

    def leaky(x):
        return jnp.where(x >= 0, x, NEG_SLOPE * x)

    h = leaky(bn_eval(conv1x1(x_ncl, raw["wfc1"], raw["bfc1"]), *raw["bn1"]))
    for i in range(BLOCK_NUM):
        y = leaky(bn_eval(conv1x1(h, raw["w1"][i], raw["b1"][i]), *raw["bnA"][i]))
        y = leaky(bn_eval(conv1x1(y, raw["w2"][i], raw["b2"][i]), *raw["bnB"][i]))
        h = h + y
    return conv1x1(h, raw["wfc2"], raw["bfc2"])


if __name__ == "__main__":
    key = jax.random.PRNGKey(0)
    kx, kp = jax.random.split(key)
    x = jax.random.normal(kx, (BATCH, CHANNEL_IN, LENGTH), dtype=jnp.float32)

    raw = make_raw_params(kp)
    wfc1, w_packed, b_packed = pack_params(raw)

    out = jax.jit(fcblock_pallas)(x, wfc1, w_packed, b_packed)
    out = jax.block_until_ready(out)

    ref = fcblock_ref(x, raw)
    assert out.shape == (BATCH, CHANNEL_OUT, LENGTH)
    assert jnp.allclose(out, ref, atol=1e-4, rtol=1e-4), float(jnp.max(jnp.abs(out - ref)))

    # TODO(synk): training-mode Dropout / BatchNorm batch statistics are not modeled
    # (eval semantics only, matching the folded-BN inference path).
    print("KERNEL_OK")
</pallas_src>

<mosaic_0001>
module attributes {stable_mosaic.version = 11 : i64} {
  func.func @fcblock_kernel(%arg0: i32, %arg1: memref<4x128xf32, #tpu.memory_space<vmem>>, %arg2: memref<32x4xf32, #tpu.memory_space<vmem>>, %arg3: memref<5x32x32xf32, #tpu.memory_space<vmem>>, %arg4: memref<6x32x1xf32, #tpu.memory_space<vmem>>, %arg5: memref<8x128xf32, #tpu.memory_space<vmem>>) attributes {dimension_semantics = [#tpu.dimension_semantics<parallel>], iteration_bounds = array<i64: 1>, scalar_prefetch = 0 : i64, scratch_operands = 0 : i64, tpu.core_type = #tpu.core_type<tc>, window_params = [{transform_indices = @transform_0, window_bounds = array<i64: 4, 128>}, {pipeline_mode = #tpu.pipeline_mode<synchronous>, transform_indices = @transform_1, window_bounds = array<i64: 32, 4>}, {pipeline_mode = #tpu.pipeline_mode<synchronous>, transform_indices = @transform_2, window_bounds = array<i64: 5, 32, 32>}, {pipeline_mode = #tpu.pipeline_mode<synchronous>, transform_indices = @transform_3, window_bounds = array<i64: 6, 32, 1>}, {transform_indices = @transform_4, window_bounds = array<i64: 8, 128>}]} {
    %c0 = arith.constant 0 : index
    %c0_0 = arith.constant 0 : index
    %0 = vector.load %arg1[%c0, %c0_0] : memref<4x128xf32, #tpu.memory_space<vmem>>, vector<4x128xf32>
    %c0_1 = arith.constant 0 : index
    %c0_2 = arith.constant 0 : index
    %1 = vector.load %arg2[%c0_1, %c0_2] : memref<32x4xf32, #tpu.memory_space<vmem>>, vector<32x4xf32>
    %cst = arith.constant dense<0.000000e+00> : vector<32x128xf32>
    %2 = tpu.matmul %1, %0, %cst {dimension_numbers = #tpu.dot_dimension_numbers<[1], [0], [0], [1], [0, 0, 1, 1], [], []>} : vector<32x4xf32>, vector<4x128xf32>, vector<32x128xf32> -> vector<32x128xf32>
    %c0_3 = arith.constant 0 : index
    %c0_4 = arith.constant 0 : index
    %c0_5 = arith.constant 0 : index
    %3 = vector.load %arg4[%c0_3, %c0_4, %c0_5] : memref<6x32x1xf32, #tpu.memory_space<vmem>>, vector<1x32x1xf32>
    %4 = vector.shape_cast %3 : vector<1x32x1xf32> to vector<32x1xf32>
    %5 = vector.broadcast %4 : vector<32x1xf32> to vector<32x128xf32>
    %6 = arith.addf %2, %5 : vector<32x128xf32>
    %cst_6 = arith.constant 2.000000e-01 : f32
    %7 = vector.broadcast %cst_6 : f32 to vector<32x128xf32>
    %8 = arith.mulf %7, %6 : vector<32x128xf32>
    %9 = arith.maximumf %6, %8 : vector<32x128xf32>
    %c0_7 = arith.constant 0 : index
    %c0_8 = arith.constant 0 : index
    %c0_9 = arith.constant 0 : index
    %10 = vector.load %arg3[%c0_7, %c0_8, %c0_9] : memref<5x32x32xf32, #tpu.memory_space<vmem>>, vector<1x32x32xf32>
    %11 = vector.shape_cast %10 : vector<1x32x32xf32> to vector<32x32xf32>
    %cst_10 = arith.constant dense<0.000000e+00> : vector<32x128xf32>
    %12 = tpu.matmul %11, %9, %cst_10 {dimension_numbers = #tpu.dot_dimension_numbers<[1], [0], [0], [1], [0, 0, 1, 1], [], []>} : vector<32x32xf32>, vector<32x128xf32>, vector<32x128xf32> -> vector<32x128xf32>
    %c1 = arith.constant 1 : index
    %c0_11 = arith.constant 0 : index
    %c0_12 = arith.constant 0 : index
    %13 = vector.load %arg4[%c1, %c0_11, %c0_12] : memref<6x32x1xf32, #tpu.memory_space<vmem>>, vector<1x32x1xf32>
    %14 = vector.shape_cast %13 : vector<1x32x1xf32> to vector<32x1xf32>
    %15 = vector.broadcast %14 : vector<32x1xf32> to vector<32x128xf32>
    %16 = arith.addf %12, %15 : vector<32x128xf32>
    %cst_13 = arith.constant 2.000000e-01 : f32
    %17 = vector.broadcast %cst_13 : f32 to vector<32x128xf32>
    %18 = arith.mulf %17, %16 : vector<32x128xf32>
    %19 = arith.maximumf %16, %18 : vector<32x128xf32>
    %c1_14 = arith.constant 1 : index
    %c0_15 = arith.constant 0 : index
    %c0_16 = arith.constant 0 : index
    %20 = vector.load %arg3[%c1_14, %c0_15, %c0_16] : memref<5x32x32xf32, #tpu.memory_space<vmem>>, vector<1x32x32xf32>
    %21 = vector.shape_cast %20 : vector<1x32x32xf32> to vector<32x32xf32>
    %cst_17 = arith.constant dense<0.000000e+00> : vector<32x128xf32>
    %22 = tpu.matmul %21, %19, %cst_17 {dimension_numbers = #tpu.dot_dimension_numbers<[1], [0], [0], [1], [0, 0, 1, 1], [], []>} : vector<32x32xf32>, vector<32x128xf32>, vector<32x128xf32> -> vector<32x128xf32>
    %c2 = arith.constant 2 : index
    %c0_18 = arith.constant 0 : index
    %c0_19 = arith.constant 0 : index
    %23 = vector.load %arg4[%c2, %c0_18, %c0_19] : memref<6x32x1xf32, #tpu.memory_space<vmem>>, vector<1x32x1xf32>
    %24 = vector.shape_cast %23 : vector<1x32x1xf32> to vector<32x1xf32>
    %25 = vector.broadcast %24 : vector<32x1xf32> to vector<32x128xf32>
    %26 = arith.addf %22, %25 : vector<32x128xf32>
    %cst_20 = arith.constant 2.000000e-01 : f32
    %27 = vector.broadcast %cst_20 : f32 to vector<32x128xf32>
    %28 = arith.mulf %27, %26 : vector<32x128xf32>
    %29 = arith.maximumf %26, %28 : vector<32x128xf32>
    %30 = arith.addf %9, %29 : vector<32x128xf32>
    %c2_21 = arith.constant 2 : index
    %c0_22 = arith.constant 0 : index
    %c0_23 = arith.constant 0 : index
    %31 = vector.load %arg3[%c2_21, %c0_22, %c0_23] : memref<5x32x32xf32, #tpu.memory_space<vmem>>, vector<1x32x32xf32>
    %32 = vector.shape_cast %31 : vector<1x32x32xf32> to vector<32x32xf32>
    %cst_24 = arith.constant dense<0.000000e+00> : vector<32x128xf32>
    %33 = tpu.matmul %32, %30, %cst_24 {dimension_numbers = #tpu.dot_dimension_numbers<[1], [0], [0], [1], [0, 0, 1, 1], [], []>} : vector<32x32xf32>, vector<32x128xf32>, vector<32x128xf32> -> vector<32x128xf32>
    %c3 = arith.constant 3 : index
    %c0_25 = arith.constant 0 : index
    %c0_26 = arith.constant 0 : index
    %34 = vector.load %arg4[%c3, %c0_25, %c0_26] : memref<6x32x1xf32, #tpu.memory_space<vmem>>, vector<1x32x1xf32>
    %35 = vector.shape_cast %34 : vector<1x32x1xf32> to vector<32x1xf32>
    %36 = vector.broadcast %35 : vector<32x1xf32> to vector<32x128xf32>
    %37 = arith.addf %33, %36 : vector<32x128xf32>
    %cst_27 = arith.constant 2.000000e-01 : f32
    %38 = vector.broadcast %cst_27 : f32 to vector<32x128xf32>
    %39 = arith.mulf %38, %37 : vector<32x128xf32>
    %40 = arith.maximumf %37, %39 : vector<32x128xf32>
    %c3_28 = arith.constant 3 : index
    %c0_29 = arith.constant 0 : index
    %c0_30 = arith.constant 0 : index
    %41 = vector.load %arg3[%c3_28, %c0_29, %c0_30] : memref<5x32x32xf32, #tpu.memory_space<vmem>>, vector<1x32x32xf32>
    %42 = vector.shape_cast %41 : vector<1x32x32xf32> to vector<32x32xf32>
    %cst_31 = arith.constant dense<0.000000e+00> : vector<32x128xf32>
    %43 = tpu.matmul %42, %40, %cst_31 {dimension_numbers = #tpu.dot_dimension_numbers<[1], [0], [0], [1], [0, 0, 1, 1], [], []>} : vector<32x32xf32>, vector<32x128xf32>, vector<32x128xf32> -> vector<32x128xf32>
    %c4 = arith.constant 4 : index
    %c0_32 = arith.constant 0 : index
    %c0_33 = arith.constant 0 : index
    %44 = vector.load %arg4[%c4, %c0_32, %c0_33] : memref<6x32x1xf32, #tpu.memory_space<vmem>>, vector<1x32x1xf32>
    %45 = vector.shape_cast %44 : vector<1x32x1xf32> to vector<32x1xf32>
    %46 = vector.broadcast %45 : vector<32x1xf32> to vector<32x128xf32>
    %47 = arith.addf %43, %46 : vector<32x128xf32>
    %cst_34 = arith.constant 2.000000e-01 : f32
    %48 = vector.broadcast %cst_34 : f32 to vector<32x128xf32>
    %49 = arith.mulf %48, %47 : vector<32x128xf32>
    %50 = arith.maximumf %47, %49 : vector<32x128xf32>
    %51 = arith.addf %30, %50 : vector<32x128xf32>
    %c4_35 = arith.constant 4 : index
    %c0_36 = arith.constant 0 : index
    %c0_37 = arith.constant 0 : index
    %52 = vector.load %arg3[%c4_35, %c0_36, %c0_37] : memref<5x32x32xf32, #tpu.memory_space<vmem>>, vector<1x8x32xf32>
    %53 = vector.shape_cast %52 : vector<1x8x32xf32> to vector<8x32xf32>
    %c5 = arith.constant 5 : index
    %c0_38 = arith.constant 0 : index
    %c0_39 = arith.constant 0 : index
    %54 = vector.load %arg4[%c5, %c0_38, %c0_39] : memref<6x32x1xf32, #tpu.memory_space<vmem>>, vector<1x8x1xf32>
    %55 = vector.shape_cast %54 : vector<1x8x1xf32> to vector<8x1xf32>
    %cst_40 = arith.constant dense<0.000000e+00> : vector<8x128xf32>
    %56 = tpu.matmul %53, %51, %cst_40 {dimension_numbers = #tpu.dot_dimension_numbers<[1], [0], [0], [1], [0, 0, 1, 1], [], []>} : vector<8x32xf32>, vector<32x128xf32>, vector<8x128xf32> -> vector<8x128xf32>
    %57 = vector.broadcast %55 : vector<8x1xf32> to vector<8x128xf32>
    %58 = arith.addf %56, %57 : vector<8x128xf32>
    %c0_41 = arith.constant 0 : index
    %c0_42 = arith.constant 0 : index
    %59 = vector.load %arg5[%c0_41, %c0_42] : memref<8x128xf32, #tpu.memory_space<vmem>>, vector<8x128xf32>
    tpu.vector_store %arg5[%c0_41, %c0_42], %58 {strides = array<i32>} : memref<8x128xf32, #tpu.memory_space<vmem>>, vector<8x128xf32>,
    return
  }
  func.func @transform_0(%arg0: i32) -> (i32, i32) {
    %c0_i32 = arith.constant 0 : i32
    %c0_i32_0 = arith.constant 0 : i32
    return %c0_i32, %arg0 : i32, i32
  }
  func.func @transform_1(%arg0: i32) -> (i32, i32) {
    %c0_i32 = arith.constant 0 : i32
    %c0_i32_0 = arith.constant 0 : i32
    %c0_i32_1 = arith.constant 0 : i32
    return %c0_i32, %c0_i32_0 : i32, i32
  }
  func.func @transform_2(%arg0: i32) -> (i32, i32, i32) {
    %c0_i32 = arith.constant 0 : i32
    %c0_i32_0 = arith.constant 0 : i32
    %c0_i32_1 = arith.constant 0 : i32
    %c0_i32_2 = arith.constant 0 : i32
    return %c0_i32, %c0_i32_0, %c0_i32_1 : i32, i32, i32
  }
  func.func @transform_3(%arg0: i32) -> (i32, i32, i32) {
    %c0_i32 = arith.constant 0 : i32
    %c0_i32_0 = arith.constant 0 : i32
    %c0_i32_1 = arith.constant 0 : i32
    %c0_i32_2 = arith.constant 0 : i32
    return %c0_i32, %c0_i32_0, %c0_i32_1 : i32, i32, i32
  }
  func.func @transform_4(%arg0: i32) -> (i32, i32) {
    %c0_i32 = arith.constant 0 : i32
    %c0_i32_0 = arith.constant 0 : i32
    return %c0_i32, %arg0 : i32, i32
  }
}

</mosaic_0001>

<bundles_post_ra>
// kernel: fcblock_pallas.1
= control target key start
LH: loop header
LB: loop body
LE: loop exit
PB: predicated region body
PF: predicated region fallthrough
CT: control target
= control target key end

     0   :  { %vm59_vm0 = vcmask 1043456   ;;  %v519_v0 = vmov 0   ;;  %vm46_vm1 = vcmask 31744   ;;  %vm129_vm2 = vcmask 261120   ;;  %s733_s3 = inlined_call_operand.vmem [shape: f32[6,32,1], index: 3, kind: input, shape index: {}]   ;;  %s734_s0 = inlined_call_operand.vmem [shape: f32[4,128], index: 0, kind: input, shape index: {}]   ;;  %s735_s1 = inlined_call_operand.vmem [shape: f32[32,4], index: 1, kind: input, shape index: {}]   ;;  %s736_s2 = inlined_call_operand.vmem [shape: f32[5,32,32], index: 2, kind: input, shape index: {}]   ;;  %s737_s4 = inlined_call_operand.vmem [shape: f32[8,128], index: 4, kind: output, shape index: {}]  }
   0x1   :  { %517 = vset.pattern.permute.xlu1 %v519_v0  ;;  %516 = vset.pattern.permute.xlu0 %v519_v0  ;;  %v25_v1 = vld [vmem:[%s733_s3 + $0x18] sm:$0xff]  ;;  %v23_v2 = vld [vmem:[%s733_s3 + $0x8] sm:$0xff]  ;;  %v17_v3 = vld [vmem:[%s734_s0] sm:$0xf] }
   0x2   :  { %43 = vperm.xlu0 %516, %v25_v1   ;;  %33 = vperm.xlu1 %517, %v23_v2   ;;  %v19_v4 = vld [vmem:[%s735_s1 + $0x8] sm:$0xff]  ;;  %v21_v5 = vld [vmem:[%s735_s1 + $0x18] sm:$0xff]  ;;  %v18_v6 = vld [vmem:[%s735_s1] sm:$0xff] }
   0x3   :  { %513 = vmatpush.msk.msra.mxu2 %vm59_vm0, %v17_v3  ;;  %514 = vmatpush.msk.msra.mxu3 %vm59_vm0, %v17_v3  ;;  %v24_v7 = vld [vmem:[%s733_s3 + $0x10] sm:$0xff]  ;;  %v22_v8 = vld [vmem:[%s733_s3] sm:$0xff]  ;;  %v467_v10 = vld [vmem:[%s733_s3 + $0x28] sm:$0xff] }
   0x4   :  { %463 = vmatmul.msk.f32.vlgmr.msra.gmra.mxu2 %vm46_vm1, %v19_v4  ;;  %465 = vmatmul.msk.f32.vlgmr.msra.gmra.mxu3 %vm46_vm1, %v21_v5  ;;  %v20_v9 = vld [vmem:[%s735_s1 + $0x10] sm:$0xff]  ;;  %v466_v11 = vld [vmem:[%s733_s3 + $0x20] sm:$0xff]  ;;  %v479_v13 = vld [vmem:[%s733_s3 + $0x48] sm:$0xff] }
   0x5   :  { %461 = vmatpush.msk.msra.mxu0 %vm59_vm0, %v17_v3  ;;  %518 = vset.pattern.permute.xlu2 %v519_v0  ;;  %v480_v12 = vld [vmem:[%s733_s3 + $0x50] sm:$0xff]  ;;  %v493_v14 = vld [vmem:[%s733_s3 + $0x78] sm:$0xff]  ;;  %v490_v16 = vld [vmem:[%s733_s3 + $0x60] sm:$0xff] }
   0x6   :  { %462 = vmatmul.msk.f32.vlgmr.msra.gmra.mxu0 %vm46_vm1, %v18_v6  ;;  %v492_v15 = vld [vmem:[%s733_s3 + $0x70] sm:$0xff]  ;;  %v505_v17 = vld [vmem:[%s733_s3 + $0x98] sm:$0xff]  ;;  %v503_v18 = vld [vmem:[%s733_s3 + $0x88] sm:$0xff] }
   0x7   :  { %v502_v19 = vld [vmem:[%s733_s3 + $0x80] sm:$0xff]  ;;  %v469_v20 = vld [vmem:[%s733_s3 + $0x38] sm:$0xff]  ;;  %v468_v22 = vld [vmem:[%s733_s3 + $0x30] sm:$0xff] }
   0x8   :  { %126 = vperm.xlu2 %518, %v469_v20   ;;  %v481_v28 = vld [vmem:[%s733_s3 + $0x58] sm:$0xff]  ;;  %v478_v39 = vld [vmem:[%s733_s3 + $0x40] sm:$0xff]  ;;  %v491_v45 = vld [vmem:[%s733_s3 + $0x68] sm:$0xff] }
   0x9   :  { %v100_v44 = vld [vmem:[%s736_s2] sm:$0xff]  ;;  %v101_v46 = vld [vmem:[%s736_s2 + $0x8] sm:$0xff]  ;;  %v504_v47 = vld [vmem:[%s733_s3 + $0x90] sm:$0xff] }
   0xa   :  { %38 = vperm.xlu0 %516, %v24_v7   ;;  %28 = vperm.xlu1 %517, %v22_v8   ;;  %v102_v48 = vld [vmem:[%s736_s2 + $0x10] sm:$0xff]  ;;  %v511_v49 = vld [vmem:[%s733_s3 + $0xa0] sm:$0xff]  ;;  %v103_v50 = vld [vmem:[%s736_s2 + $0x18] sm:$0xff] }
   0xb   :  { %v474_v7 = vld [vmem:[%s736_s2 + $0x20] sm:$0xff]  ;;  %v475_v8 = vld [vmem:[%s736_s2 + $0x28] sm:$0xff] }
   0xc   :  { %464 = vmatmul.msk.f32.gmra.mxu2 %vm46_vm1, %v20_v9  ;;  %v476_v9 = vld [vmem:[%s736_s2 + $0x30] sm:$0xff] }
  0x10   :  { %121 = vperm.xlu2 %518, %v468_v22  }
  0x12   :  { %116 = vperm.xlu0 %516, %v467_v10   ;;  %111 = vperm.xlu1 %517, %v466_v11   ;;  %v477_v10 = vld [vmem:[%s736_s2 + $0x38] sm:$0xff] }
  0x18   :  { %206 = vperm.xlu2 %518, %v481_v28  }
  0x1a   :  { %201 = vperm.xlu0 %516, %v480_v12   ;;  %196 = vperm.xlu1 %517, %v479_v13  }
  0x20   :  { %191 = vperm.xlu2 %518, %v478_v39  }
  0x22   :  { %289 = vperm.xlu0 %516, %v493_v14   ;;  %284 = vperm.xlu1 %517, %v492_v15  }
  0x28   :  { %279 = vperm.xlu2 %518, %v491_v45  }
  0x2a   :  { %274 = vperm.xlu0 %516, %v490_v16   ;;  %368 = vperm.xlu1 %517, %v505_v17  }
  0x30   :  { %363 = vperm.xlu2 %518, %v504_v47  }
  0x32   :  { %358 = vperm.xlu0 %516, %v503_v18   ;;  %353 = vperm.xlu1 %517, %v502_v19  }
  0x38   :  { %430 = vperm.xlu2 %518, %v511_v49  }
  0x62   :  { %v127_v53 = vpop.permute.xlu2 %126 }
  0x6a   :  { %v122_v55 = vpop.permute.xlu2 %121 }
  0x72   :  { %v207_v13 = vpop.permute.xlu2 %206 }
  0x74   :  { %v44_v21 = vpop.permute.xlu0 %43  ;;  %v34_v23 = vpop.permute.xlu1 %33 }
  0x7a   :  { %v192_v19 = vpop.permute.xlu2 %191 }
  0x7c   :  { %v39_v31 = vpop.permute.xlu0 %38  ;;  %v29_v33 = vpop.permute.xlu1 %28 }
  0x82   :  { %v280_v45 = vpop.permute.xlu2 %279 }
  0x83   :  { %v80_v30 = vpop.f32.mrf.mxu0 }
  0x84   :  { %v81_v35 = vadd.f32 %v80_v30, %v29_v33  ;;  %v117_v57 = vpop.permute.xlu0 %116  ;;  %v112_v61 = vpop.permute.xlu1 %111 }
  0x86   :  { %v92_v40 = vmul.f32 0.2, %v81_v35 }
  0x87   :  { %v83_v24 = vpop.f32.mrf.mxu2  ;;  %v89_v25 = vpop.f32.mrf.mxu3 }
  0x88   :  { %v90_v26 = vadd.f32 %v89_v25, %v44_v21  ;;  %v84_v32 = vadd.f32 %v83_v24, %v34_v23  ;;  %v630_v43 = vmax.f32 %v81_v35, %v92_v40 }
  0x8a   :  { %v95_v27 = vmul.f32 0.2, %v90_v26  ;;  %v93_v37 = vmul.f32 0.2, %v84_v32 }
  0x8c   :  { %v618_v29 = vmax.f32 %v90_v26, %v95_v27  ;;  %v627_v42 = vmax.f32 %v84_v32, %v93_v37  ;;  %v202_v15 = vpop.permute.xlu0 %201  ;;  %v197_v17 = vpop.permute.xlu1 %196  ;;  %v488_v37 = vld [vmem:[%s736_s2 + $0x50] sm:$0xff] }
  0x8e   :  { %154 = vmatpush.msra.mxu1 %v618_v29 }
  0x8f   :  { %v86_v34 = vpop.f32.mrf.mxu2 }
  0x90   :  { %v87_v36 = vadd.f32 %v86_v34, %v39_v31 }
  0x92   :  { %v94_v38 = vmul.f32 0.2, %v87_v36 }
  0x94   :  { %v624_v41 = vmax.f32 %v87_v36, %v94_v38  ;;  %v487_v36 = vld [vmem:[%s736_s2 + $0x48] sm:$0xff]  ;;  %v489_v38 = vld [vmem:[%s736_s2 + $0x58] sm:$0xff] }
  0x96   :  { %155 = vmatpush.msra.mxu1 %v624_v41 }
  0x98   :  { %156 = vmatpush.msra.mxu1 %v627_v42 }
  0x9a   :  { %157 = vmatpush.msra.mxu1 %v630_v43 }
  0x9b   :  { %470 = vmatmul.msk.f32.vlgmr.msra.gmra.mxu1 %vm129_vm2, %v100_v44 }
  0xa3   :  { %471 = vmatmul.msk.f32.gmra.mxu1 %vm129_vm2, %v101_v46 }
  0xab   :  { %472 = vmatmul.msk.f32.gmra.mxu1 %vm129_vm2, %v102_v48 }
  0xb3   :  { %473 = vmatmul.msk.f32.gmra.mxu1 %vm129_vm2, %v103_v50 }
 0x118   :  { %v159_v51 = vpop.f32.mrf.mxu1 }
 0x119   :  { %v160_v62 = vadd.f32 %v159_v51, %v112_v61  ;;  %v500_v61 = vld [vmem:[%s736_s2 + $0x70] sm:$0xff] }
 0x11b   :  { %v171_v3 = vmul.f32 0.2, %v160_v62 }
 0x11d   :  { %v175_v6 = vmax.f32 %v160_v62, %v171_v3  ;;  %v501_v62 = vld [vmem:[%s736_s2 + $0x78] sm:$0xff]  ;;  %v364_v3 = vpop.permute.xlu2 %363 }
 0x120   :  { %v162_v52 = vpop.f32.mrf.mxu1 }
 0x121   :  { %v163_v59 = vadd.f32 %v162_v52, %v117_v57 }
 0x123   :  { %v172_v1 = vmul.f32 0.2, %v163_v59 }
 0x125   :  { %v176_v5 = vmax.f32 %v163_v59, %v172_v1  ;;  %v498_v59 = vld [vmem:[%s736_s2 + $0x60] sm:$0xff] }
 0x128   :  { %v165_v54 = vpop.f32.mrf.mxu1 }
 0x129   :  { %v166_v56 = vadd.f32 %v165_v54, %v122_v55 }
 0x12b   :  { %v173_v63 = vmul.f32 0.2, %v166_v56 }
 0x12d   :  { %v177_v4 = vmax.f32 %v166_v56, %v173_v63 }
 0x130   :  { %v168_v58 = vpop.f32.mrf.mxu1 }
 0x131   :  { %v169_v60 = vadd.f32 %v168_v58, %v127_v53 }
 0x133   :  { %v174_v0 = vmul.f32 0.2, %v169_v60 }
 0x135   :  { %v178_v2 = vmax.f32 %v169_v60, %v174_v0  ;;  %v499_v60 = vld [vmem:[%s736_s2 + $0x68] sm:$0xff] }
 0x137   :  { %233 = vmatpush.msrb.mxu2 %v178_v2 }
 0x139   :  { %234 = vmatpush.msrb.mxu2 %v177_v4 }
 0x13b   :  { %235 = vmatpush.msrb.mxu2 %v176_v5 }
 0x13d   :  { %236 = vmatpush.msrb.mxu2 %v175_v6 }
 0x13e   :  { %482 = vmatmul.msk.f32.vlgmr.msrb.gmra.mxu2 %vm129_vm2, %v474_v7 }
 0x146   :  { %483 = vmatmul.msk.f32.gmra.mxu2 %vm129_vm2, %v475_v8 }
 0x14e   :  { %484 = vmatmul.msk.f32.gmra.mxu2 %vm129_vm2, %v476_v9 }
 0x156   :  { %485 = vmatmul.msk.f32.gmra.mxu2 %vm129_vm2, %v477_v10 }
 0x1c1   :  { %v238_v11 = vpop.f32.mrf.mxu2 }
 0x1c2   :  { %v239_v21 = vadd.f32 %v238_v11, %v192_v19 }
 0x1c4   :  { %v250_v26 = vmul.f32 0.2, %v239_v21 }
 0x1c6   :  { %v254_v32 = vmax.f32 %v239_v21, %v250_v26 }
 0x1c8   :  { %v687_v35 = vadd.f32 %v254_v32, %v630_v43  ;;  %v285_v43 = vpop.permute.xlu1 %284 }
 0x1c9   :  { %v241_v12 = vpop.f32.mrf.mxu2 }
 0x1ca   :  { %v242_v18 = vadd.f32 %v241_v12, %v197_v17 }
 0x1cc   :  { %v251_v24 = vmul.f32 0.2, %v242_v18 }
 0x1ce   :  { %v255_v30 = vmax.f32 %v242_v18, %v251_v24  ;;  %v431_v24 = vpop.permute.xlu2 %430 }
 0x1d0   :  { %v683_v34 = vadd.f32 %v255_v30, %v627_v42  ;;  %v369_v1 = vpop.permute.xlu1 %368 }
 0x1d1   :  { %v244_v14 = vpop.f32.mrf.mxu2 }
 0x1d2   :  { %v245_v16 = vadd.f32 %v244_v14, %v202_v15 }
 0x1d4   :  { %v252_v22 = vmul.f32 0.2, %v245_v16 }
 0x1d6   :  { %v256_v27 = vmax.f32 %v245_v16, %v252_v22 }
 0x1d8   :  { %v679_v33 = vadd.f32 %v256_v27, %v624_v41  ;;  %v290_v41 = vpop.permute.xlu0 %289  ;;  %v354_v7 = vpop.permute.xlu1 %353 }
 0x1d9   :  { %v247_v20 = vpop.f32.mrf.mxu2 }
 0x1da   :  { %v248_v23 = vadd.f32 %v247_v20, %v207_v13 }
 0x1dc   :  { %v253_v25 = vmul.f32 0.2, %v248_v23 }
 0x1de   :  { %v257_v28 = vmax.f32 %v248_v23, %v253_v25  ;;  %v510_v23 = vld [vmem:[%s736_s2 + $0x80] sm:$0xff] }
 0x1e0   :  { %v675_v31 = vadd.f32 %v257_v28, %v618_v29  ;;  %v486_v29 = vld [vmem:[%s736_s2 + $0x40] sm:$0xff]  ;;  %v275_v49 = vpop.permute.xlu0 %274 }
 0x1e2   :  { %316 = vmatpush.msrb.mxu3 %v675_v31 }
 0x1e4   :  { %317 = vmatpush.msrb.mxu3 %v679_v33 }
 0x1e6   :  { %318 = vmatpush.msrb.mxu3 %v683_v34 }
 0x1e8   :  { %319 = vmatpush.msrb.mxu3 %v687_v35  ;;  %v359_v5 = vpop.permute.xlu0 %358 }
 0x1e9   :  { %494 = vmatmul.msk.f32.vlgmr.msrb.gmra.mxu3 %vm129_vm2, %v486_v29 }
 0x1f1   :  { %495 = vmatmul.msk.f32.gmra.mxu3 %vm129_vm2, %v487_v36 }
 0x1f9   :  { %496 = vmatmul.msk.f32.gmra.mxu3 %vm129_vm2, %v488_v37 }
 0x201   :  { %497 = vmatmul.msk.f32.gmra.mxu3 %vm129_vm2, %v489_v38 }
 0x26c   :  { %v321_v39 = vpop.f32.mrf.mxu3 }
 0x26d   :  { %v322_v50 = vadd.f32 %v321_v39, %v275_v49 }
 0x26f   :  { %v333_v55 = vmul.f32 0.2, %v322_v50 }
 0x271   :  { %v337_v58 = vmax.f32 %v322_v50, %v333_v55 }
 0x274   :  { %v324_v40 = vpop.f32.mrf.mxu3 }
 0x275   :  { %v325_v47 = vadd.f32 %v324_v40, %v280_v45 }
 0x277   :  { %v334_v53 = vmul.f32 0.2, %v325_v47 }
 0x279   :  { %v338_v57 = vmax.f32 %v325_v47, %v334_v53 }
 0x27c   :  { %v327_v42 = vpop.f32.mrf.mxu3 }
 0x27d   :  { %v328_v44 = vadd.f32 %v327_v42, %v285_v43 }
 0x27f   :  { %v335_v51 = vmul.f32 0.2, %v328_v44 }
 0x281   :  { %v339_v56 = vmax.f32 %v328_v44, %v335_v51 }
 0x284   :  { %v330_v46 = vpop.f32.mrf.mxu3 }
 0x285   :  { %v331_v48 = vadd.f32 %v330_v46, %v290_v41 }
 0x287   :  { %v336_v52 = vmul.f32 0.2, %v331_v48 }
 0x289   :  { %v340_v54 = vmax.f32 %v331_v48, %v336_v52 }
 0x28b   :  { %395 = vmatpush.msrb.mxu0 %v340_v54 }
 0x28d   :  { %396 = vmatpush.msrb.mxu0 %v339_v56 }
 0x28f   :  { %397 = vmatpush.msrb.mxu0 %v338_v57 }
 0x291   :  { %398 = vmatpush.msrb.mxu0 %v337_v58 }
 0x292   :  { %506 = vmatmul.msk.f32.vlgmr.msrb.gmra.mxu0 %vm129_vm2, %v498_v59 }
 0x29a   :  { %507 = vmatmul.msk.f32.gmra.mxu0 %vm129_vm2, %v499_v60 }
 0x2a2   :  { %508 = vmatmul.msk.f32.gmra.mxu0 %vm129_vm2, %v500_v61 }
 0x2aa   :  { %509 = vmatmul.msk.f32.gmra.mxu0 %vm129_vm2, %v501_v62 }
 0x30f   :  { %v400_v63 = vpop.f32.mrf.mxu0 }
 0x310   :  { %v401_v9 = vadd.f32 %v400_v63, %v354_v7 }
 0x312   :  { %v412_v14 = vmul.f32 0.2, %v401_v9 }
 0x314   :  { %v416_v19 = vmax.f32 %v401_v9, %v412_v14 }
 0x316   :  { %v420_v22 = vadd.f32 %v416_v19, %v687_v35 }
 0x317   :  { %v403_v0 = vpop.f32.mrf.mxu0 }
 0x318   :  { %v404_v6 = vadd.f32 %v403_v0, %v359_v5 }
 0x31a   :  { %v413_v12 = vmul.f32 0.2, %v404_v6 }
 0x31c   :  { %v417_v17 = vmax.f32 %v404_v6, %v413_v12 }
 0x31e   :  { %v421_v21 = vadd.f32 %v417_v17, %v683_v34 }
 0x31f   :  { %v406_v2 = vpop.f32.mrf.mxu0 }
 0x320   :  { %v407_v4 = vadd.f32 %v406_v2, %v364_v3 }
 0x322   :  { %v414_v10 = vmul.f32 0.2, %v407_v4 }
 0x324   :  { %v418_v15 = vmax.f32 %v407_v4, %v414_v10 }
 0x326   :  { %v422_v20 = vadd.f32 %v418_v15, %v679_v33 }
 0x327   :  { %v409_v8 = vpop.f32.mrf.mxu0 }
 0x328   :  { %v410_v11 = vadd.f32 %v409_v8, %v369_v1 }
 0x32a   :  { %v415_v13 = vmul.f32 0.2, %v410_v11 }
 0x32c   :  { %v419_v16 = vmax.f32 %v410_v11, %v415_v13 }
 0x32e   :  { %v423_v18 = vadd.f32 %v419_v16, %v675_v31 }
 0x330   :  { %448 = vmatpush.msrb.mxu1 %v423_v18 }
 0x332   :  { %449 = vmatpush.msrb.mxu1 %v422_v20 }
 0x334   :  { %450 = vmatpush.msrb.mxu1 %v421_v21 }
 0x336   :  { %451 = vmatpush.msrb.mxu1 %v420_v22 }
 0x337   :  { %512 = vmatmul.msk.f32.vlgmr.msrb.gmra.mxu1 %vm129_vm2, %v510_v23 }
 0x3b4   :  { %v453_v25 = vpop.f32.mrf.mxu1 }
 0x3b5   :  { %v454_v26 = vadd.f32 %v453_v25, %v431_v24 }
 0x3b7   :  { %456 = vst [vmem:[%s737_s4] sm:$0xff] %v454_v26 }

</bundles_post_ra>
